<compile_context>
chip_gen: v6e
topology: v6e:2x2x1
jax: 0.10.0
libtpu: 0.0.40
codegen_flags: <defaults>
</compile_context>

<pallas_src>
import jax
import jax.numpy as jnp
from jax.experimental import pallas as pl
from jax.experimental.pallas import tpu as pltpu


def _round_up(x, m):
    return (x + m - 1) // m * m


def _pad2d(a, rows, cols):
    r, c = a.shape
    return jnp.pad(a, ((0, rows - r), (0, cols - c)))


def gml_kernel(x1_ref, x2_ref,
               w1_ref, b1_ref,
               w2_ref, b2_ref,
               wa_ref, ba_ref,
               wc_ref, bc_ref,
               o_ref):
    # hidden projections + tanh (f32 accumulation on the MXU)
    h1 = jnp.tanh(
        jnp.dot(x1_ref[...], w1_ref[...], preferred_element_type=jnp.float32)
        + b1_ref[...])
    h2 = jnp.tanh(
        jnp.dot(x2_ref[...], w2_ref[...], preferred_element_type=jnp.float32)
        + b2_ref[...])

    # gate: sigmoid(hidden_att(cat(h1, h2))) — single fused K=2*size_out matmul.
    hcat = jnp.concatenate([h1, h2], axis=-1)
    z = jax.nn.sigmoid(
        jnp.dot(hcat, wa_ref[...], preferred_element_type=jnp.float32)
        + ba_ref[...])

    # gated fusion + classifier head
    fusion = z * h1 + (1.0 - z) * h2
    out = (jnp.dot(fusion, wc_ref[...], preferred_element_type=jnp.float32)
           + bc_ref[...])
    o_ref[...] = out.astype(o_ref.dtype)


def gated_multimodal_layer(x1, x2, params, *, tm=256):
    """x1: (B, S, size_in1), x2: (B, S, size_in2) -> (B, S, out_channel)."""
    w1, b1, w2, b2, wa, ba, wc, bc = params
    B, S, d1 = x1.shape
    d2 = x2.shape[-1]
    size_out = w1.shape[1]
    out_channel = wc.shape[1]

    LANES = 128
    d1p = _round_up(d1, LANES)
    d2p = _round_up(d2, LANES)
    sop = _round_up(size_out, LANES)
    ncp = _round_up(out_channel, LANES)

    # --- rows: flatten (B, S) and pad to a multiple of the row tile ---------
    M = B * S
    tm_eff = min(tm, _round_up(M, 8))          # keep tiny problems tiny
    M_pad = _round_up(M, tm_eff)
    x1f = jnp.pad(x1.reshape(M, d1), ((0, M_pad - M), (0, d1p - d1)))
    x2f = jnp.pad(x2.reshape(M, d2), ((0, M_pad - M), (0, d2p - d2)))

    # --- lane-pad weights / biases (zero padding is numerically exact) ------
    w1p = _pad2d(w1, d1p, sop)
    b1p = _pad2d(b1.reshape(1, -1), 1, sop)
    w2p = _pad2d(w2, d2p, sop)
    b2p = _pad2d(b2.reshape(1, -1), 1, sop)
    # hidden_att weight: pad each K-half separately so that the in-kernel
    # lane-concat cat(h1_pad, h2_pad) lines up with the padded K rows.
    wa1p = _pad2d(wa[:size_out, :], sop, sop)
    wa2p = _pad2d(wa[size_out:, :], sop, sop)
    wap = jnp.concatenate([wa1p, wa2p], axis=0)          # (2*sop, sop)
    bap = _pad2d(ba.reshape(1, -1), 1, sop)
    wcp = _pad2d(wc, sop, ncp)
    bcp = _pad2d(bc.reshape(1, -1), 1, ncp)

    full = lambda i: (0, 0)   # weights / biases: same block for every tile
    rows = lambda i: (i, 0)   # row-tiled activations / output

    # advisory cost estimate for the XLA scheduler
    flops = 2 * M_pad * (d1p * sop + d2p * sop + 2 * sop * sop + sop * ncp)
    transcendentals = 3 * M_pad * sop          # 2x tanh + 1x sigmoid
    bytes_accessed = 4 * (M_pad * (d1p + d2p + ncp)
                          + d1p * sop + d2p * sop + 2 * sop * sop + sop * ncp
                          + 3 * sop + ncp)

    out_flat = pl.pallas_call(
        gml_kernel,
        out_shape=jax.ShapeDtypeStruct((M_pad, ncp), x1.dtype),
        grid_spec=pltpu.PrefetchScalarGridSpec(
            num_scalar_prefetch=0,
            grid=(M_pad // tm_eff,),
            in_specs=[
                pl.BlockSpec((tm_eff, d1p), rows),        # x1
                pl.BlockSpec((tm_eff, d2p), rows),        # x2
                pl.BlockSpec((d1p, sop), full),           # W1
                pl.BlockSpec((1, sop), full),             # b1
                pl.BlockSpec((d2p, sop), full),           # W2
                pl.BlockSpec((1, sop), full),             # b2
                pl.BlockSpec((2 * sop, sop), full),       # Wa (fused, padded)
                pl.BlockSpec((1, sop), full),             # ba
                pl.BlockSpec((sop, ncp), full),           # Wc
                pl.BlockSpec((1, ncp), full),             # bc
            ],
            out_specs=pl.BlockSpec((tm_eff, ncp), rows),  # lane-dense output
        ),
        compiler_params=pltpu.CompilerParams(
            dimension_semantics=("parallel",),
            vmem_limit_bytes=32 * 1024 * 1024),
        cost_estimate=pl.CostEstimate(
            flops=flops,
            transcendentals=transcendentals,
            bytes_accessed=bytes_accessed),
    )(x1f, x2f, w1p, b1p, w2p, b2p, wap, bap, wcp, bcp)

    # drop row / lane padding and restore (B, S, out_channel)
    return out_flat[:M, :out_channel].reshape(B, S, out_channel)


def init_params(key, out_channel, size_in1, size_in2, size_out, dtype=jnp.float32):
    """Deterministic synthetic parameters; Linear weights stored as (in, out)."""
    ks = jax.random.split(key, 8)
    scale = 0.05
    w1 = scale * jax.random.normal(ks[0], (size_in1, size_out), dtype)
    b1 = scale * jax.random.normal(ks[1], (size_out,), dtype)
    w2 = scale * jax.random.normal(ks[2], (size_in2, size_out), dtype)
    b2 = scale * jax.random.normal(ks[3], (size_out,), dtype)
    wa = scale * jax.random.normal(ks[4], (2 * size_out, size_out), dtype)
    ba = scale * jax.random.normal(ks[5], (size_out,), dtype)
    wc = scale * jax.random.normal(ks[6], (size_out, out_channel), dtype)
    bc = scale * jax.random.normal(ks[7], (out_channel,), dtype)
    return (w1, b1, w2, b2, wa, ba, wc, bc)


def reference_forward(x1, x2, params):
    """Plain-JAX reference mirroring the PyTorch module."""
    w1, b1, w2, b2, wa, ba, wc, bc = params
    h1 = jnp.tanh(x1 @ w1 + b1)
    h2 = jnp.tanh(x2 @ w2 + b2)
    x = jnp.concatenate((h1, h2), axis=2)
    z = jax.nn.sigmoid(x @ wa + ba)
    fusion = z * h1 + (1.0 - z) * h2
    return fusion @ wc + bc


if __name__ == "__main__":
    # small shapes consistent with the module's forward (3-D inputs, concat on dim=2)
    B, S = 2, 8
    size_in1, size_in2, size_out, out_channel = 32, 48, 64, 16

    key = jax.random.PRNGKey(0)
    kx1, kx2, kp = jax.random.split(key, 3)
    x1 = jax.random.normal(kx1, (B, S, size_in1), jnp.float32)
    x2 = jax.random.normal(kx2, (B, S, size_in2), jnp.float32)
    params = init_params(kp, out_channel, size_in1, size_in2, size_out)

    out = gated_multimodal_layer(x1, x2, params)
    out = jax.block_until_ready(out)

    ref = reference_forward(x1, x2, params)
    assert out.shape == (B, S, out_channel)
    assert jnp.allclose(out, ref, atol=1e-5, rtol=1e-5)

    print("KERNEL_OK")
</pallas_src>

<mosaic_0001>
module attributes {stable_mosaic.version = 11 : i64} {
  func.func @gml_kernel(%arg0: i32, %arg1: memref<16x128xf32, #tpu.memory_space<vmem>>, %arg2: memref<16x128xf32, #tpu.memory_space<vmem>>, %arg3: memref<128x128xf32, #tpu.memory_space<vmem>>, %arg4: memref<1x128xf32, #tpu.memory_space<vmem>>, %arg5: memref<128x128xf32, #tpu.memory_space<vmem>>, %arg6: memref<1x128xf32, #tpu.memory_space<vmem>>, %arg7: memref<256x128xf32, #tpu.memory_space<vmem>>, %arg8: memref<1x128xf32, #tpu.memory_space<vmem>>, %arg9: memref<128x128xf32, #tpu.memory_space<vmem>>, %arg10: memref<1x128xf32, #tpu.memory_space<vmem>>, %arg11: memref<16x128xf32, #tpu.memory_space<vmem>>) attributes {dimension_semantics = [#tpu.dimension_semantics<parallel>], iteration_bounds = array<i64: 1>, scalar_prefetch = 0 : i64, scratch_operands = 0 : i64, tpu.core_type = #tpu.core_type<tc>, window_params = [{transform_indices = @transform_0, window_bounds = array<i64: 16, 128>}, {transform_indices = @transform_1, window_bounds = array<i64: 16, 128>}, {pipeline_mode = #tpu.pipeline_mode<synchronous>, transform_indices = @transform_2, window_bounds = array<i64: 128, 128>}, {pipeline_mode = #tpu.pipeline_mode<synchronous>, transform_indices = @transform_3, window_bounds = array<i64: 1, 128>}, {pipeline_mode = #tpu.pipeline_mode<synchronous>, transform_indices = @transform_4, window_bounds = array<i64: 128, 128>}, {pipeline_mode = #tpu.pipeline_mode<synchronous>, transform_indices = @transform_5, window_bounds = array<i64: 1, 128>}, {pipeline_mode = #tpu.pipeline_mode<synchronous>, transform_indices = @transform_6, window_bounds = array<i64: 256, 128>}, {pipeline_mode = #tpu.pipeline_mode<synchronous>, transform_indices = @transform_7, window_bounds = array<i64: 1, 128>}, {pipeline_mode = #tpu.pipeline_mode<synchronous>, transform_indices = @transform_8, window_bounds = array<i64: 128, 128>}, {pipeline_mode = #tpu.pipeline_mode<synchronous>, transform_indices = @transform_9, window_bounds = array<i64: 1, 128>}, {transform_indices = @transform_10, window_bounds = array<i64: 16, 128>}]} {
    %c0 = arith.constant 0 : index
    %c0_0 = arith.constant 0 : index
    %0 = vector.load %arg1[%c0, %c0_0] : memref<16x128xf32, #tpu.memory_space<vmem>>, vector<16x128xf32>
    %c0_1 = arith.constant 0 : index
    %c0_2 = arith.constant 0 : index
    %1 = vector.load %arg3[%c0_1, %c0_2] : memref<128x128xf32, #tpu.memory_space<vmem>>, vector<128x128xf32>
    %cst = arith.constant dense<0.000000e+00> : vector<16x128xf32>
    %2 = tpu.matmul %0, %1, %cst {dimension_numbers = #tpu.dot_dimension_numbers<[1], [0], [0], [1], [0, 0, 1, 1], [], []>} : vector<16x128xf32>, vector<128x128xf32>, vector<16x128xf32> -> vector<16x128xf32>
    %c0_3 = arith.constant 0 : index
    %c0_4 = arith.constant 0 : index
    %3 = vector.load %arg4[%c0_3, %c0_4] : memref<1x128xf32, #tpu.memory_space<vmem>>, vector<1x128xf32>
    %4 = vector.broadcast %3 : vector<1x128xf32> to vector<16x128xf32>
    %5 = arith.addf %2, %4 : vector<16x128xf32>
    %6 = math.tanh %5 : vector<16x128xf32>
    %c0_5 = arith.constant 0 : index
    %c0_6 = arith.constant 0 : index
    %7 = vector.load %arg2[%c0_5, %c0_6] : memref<16x128xf32, #tpu.memory_space<vmem>>, vector<16x128xf32>
    %c0_7 = arith.constant 0 : index
    %c0_8 = arith.constant 0 : index
    %8 = vector.load %arg5[%c0_7, %c0_8] : memref<128x128xf32, #tpu.memory_space<vmem>>, vector<128x128xf32>
    %cst_9 = arith.constant dense<0.000000e+00> : vector<16x128xf32>
    %9 = tpu.matmul %7, %8, %cst_9 {dimension_numbers = #tpu.dot_dimension_numbers<[1], [0], [0], [1], [0, 0, 1, 1], [], []>} : vector<16x128xf32>, vector<128x128xf32>, vector<16x128xf32> -> vector<16x128xf32>
    %c0_10 = arith.constant 0 : index
    %c0_11 = arith.constant 0 : index
    %10 = vector.load %arg6[%c0_10, %c0_11] : memref<1x128xf32, #tpu.memory_space<vmem>>, vector<1x128xf32>
    %11 = vector.broadcast %10 : vector<1x128xf32> to vector<16x128xf32>
    %12 = arith.addf %9, %11 : vector<16x128xf32>
    %13 = math.tanh %12 : vector<16x128xf32>
    %14 = tpu.concatenate %6, %13 in 1 : vector<16x128xf32>, vector<16x128xf32> -> vector<16x256xf32>
    %c0_12 = arith.constant 0 : index
    %c0_13 = arith.constant 0 : index
    %15 = vector.load %arg7[%c0_12, %c0_13] : memref<256x128xf32, #tpu.memory_space<vmem>>, vector<256x128xf32>
    %cst_14 = arith.constant dense<0.000000e+00> : vector<16x128xf32>
    %16 = tpu.matmul %14, %15, %cst_14 {dimension_numbers = #tpu.dot_dimension_numbers<[1], [0], [0], [1], [0, 0, 1, 1], [], []>} : vector<16x256xf32>, vector<256x128xf32>, vector<16x128xf32> -> vector<16x128xf32>
    %c0_15 = arith.constant 0 : index
    %c0_16 = arith.constant 0 : index
    %17 = vector.load %arg8[%c0_15, %c0_16] : memref<1x128xf32, #tpu.memory_space<vmem>>, vector<1x128xf32>
    %18 = vector.broadcast %17 : vector<1x128xf32> to vector<16x128xf32>
    %19 = arith.addf %16, %18 : vector<16x128xf32>
    %20 = arith.negf %19 : vector<16x128xf32>
    %21 = math.exp %20 : vector<16x128xf32>
    %cst_17 = arith.constant 1.000000e+00 : f32
    %22 = vector.broadcast %cst_17 : f32 to vector<16x128xf32>
    %23 = arith.addf %22, %21 : vector<16x128xf32>
    %24 = arith.divf %22, %23 : vector<16x128xf32>
    %25 = arith.mulf %24, %6 : vector<16x128xf32>
    %cst_18 = arith.constant 1.000000e+00 : f32
    %26 = vector.broadcast %cst_18 : f32 to vector<16x128xf32>
    %27 = arith.subf %26, %24 : vector<16x128xf32>
    %28 = arith.mulf %27, %13 : vector<16x128xf32>
    %29 = arith.addf %25, %28 : vector<16x128xf32>
    %c0_19 = arith.constant 0 : index
    %c0_20 = arith.constant 0 : index
    %30 = vector.load %arg9[%c0_19, %c0_20] : memref<128x128xf32, #tpu.memory_space<vmem>>, vector<128x128xf32>
    %cst_21 = arith.constant dense<0.000000e+00> : vector<16x128xf32>
    %31 = tpu.matmul %29, %30, %cst_21 {dimension_numbers = #tpu.dot_dimension_numbers<[1], [0], [0], [1], [0, 0, 1, 1], [], []>} : vector<16x128xf32>, vector<128x128xf32>, vector<16x128xf32> -> vector<16x128xf32>
    %c0_22 = arith.constant 0 : index
    %c0_23 = arith.constant 0 : index
    %32 = vector.load %arg10[%c0_22, %c0_23] : memref<1x128xf32, #tpu.memory_space<vmem>>, vector<1x128xf32>
    %33 = vector.broadcast %32 : vector<1x128xf32> to vector<16x128xf32>
    %34 = arith.addf %31, %33 : vector<16x128xf32>
    %c0_24 = arith.constant 0 : index
    %c0_25 = arith.constant 0 : index
    %35 = vector.load %arg11[%c0_24, %c0_25] : memref<16x128xf32, #tpu.memory_space<vmem>>, vector<16x128xf32>
    tpu.vector_store %arg11[%c0_24, %c0_25], %34 {strides = array<i32>} : memref<16x128xf32, #tpu.memory_space<vmem>>, vector<16x128xf32>,
    return
  }
  func.func @transform_0(%arg0: i32) -> (i32, i32) {
    %c0_i32 = arith.constant 0 : i32
    %c0_i32_0 = arith.constant 0 : i32
    return %arg0, %c0_i32 : i32, i32
  }
  func.func @transform_1(%arg0: i32) -> (i32, i32) {
    %c0_i32 = arith.constant 0 : i32
    %c0_i32_0 = arith.constant 0 : i32
    return %arg0, %c0_i32 : i32, i32
  }
  func.func @transform_2(%arg0: i32) -> (i32, i32) {
    %c0_i32 = arith.constant 0 : i32
    %c0_i32_0 = arith.constant 0 : i32
    %c0_i32_1 = arith.constant 0 : i32
    return %c0_i32, %c0_i32_0 : i32, i32
  }
  func.func @transform_3(%arg0: i32) -> (i32, i32) {
    %c0_i32 = arith.constant 0 : i32
    %c0_i32_0 = arith.constant 0 : i32
    %c0_i32_1 = arith.constant 0 : i32
    return %c0_i32, %c0_i32_0 : i32, i32
  }
  func.func @transform_4(%arg0: i32) -> (i32, i32) {
    %c0_i32 = arith.constant 0 : i32
    %c0_i32_0 = arith.constant 0 : i32
    %c0_i32_1 = arith.constant 0 : i32
    return %c0_i32, %c0_i32_0 : i32, i32
  }
  func.func @transform_5(%arg0: i32) -> (i32, i32) {
    %c0_i32 = arith.constant 0 : i32
    %c0_i32_0 = arith.constant 0 : i32
    %c0_i32_1 = arith.constant 0 : i32
    return %c0_i32, %c0_i32_0 : i32, i32
  }
  func.func @transform_6(%arg0: i32) -> (i32, i32) {
    %c0_i32 = arith.constant 0 : i32
    %c0_i32_0 = arith.constant 0 : i32
    %c0_i32_1 = arith.constant 0 : i32
    return %c0_i32, %c0_i32_0 : i32, i32
  }
  func.func @transform_7(%arg0: i32) -> (i32, i32) {
    %c0_i32 = arith.constant 0 : i32
    %c0_i32_0 = arith.constant 0 : i32
    %c0_i32_1 = arith.constant 0 : i32
    return %c0_i32, %c0_i32_0 : i32, i32
  }
  func.func @transform_8(%arg0: i32) -> (i32, i32) {
    %c0_i32 = arith.constant 0 : i32
    %c0_i32_0 = arith.constant 0 : i32
    %c0_i32_1 = arith.constant 0 : i32
    return %c0_i32, %c0_i32_0 : i32, i32
  }
  func.func @transform_9(%arg0: i32) -> (i32, i32) {
    %c0_i32 = arith.constant 0 : i32
    %c0_i32_0 = arith.constant 0 : i32
    %c0_i32_1 = arith.constant 0 : i32
    return %c0_i32, %c0_i32_0 : i32, i32
  }
  func.func @transform_10(%arg0: i32) -> (i32, i32) {
    %c0_i32 = arith.constant 0 : i32
    %c0_i32_0 = arith.constant 0 : i32
    return %arg0, %c0_i32 : i32, i32
  }
}

</mosaic_0001>

<bundles_post_ra>
// kernel: tpu_custom_call.1
= control target key start
LH: loop header
LB: loop body
LE: loop exit
PB: predicated region body
PF: predicated region fallthrough
CT: control target
= control target key end

     0   :  { %15 = vsyncpa [#allocation3], 0  ;;  %s1088_s0 = inlined_call_operand.hbm [shape: f32[16,128], index: 0, kind: input, shape index: {}]   ;;  %s1089_s1 = inlined_call_operand.hbm [shape: f32[16,128], index: 1, kind: input, shape index: {}]   ;;  %s1090_s2 = inlined_call_operand.hbm [shape: f32[128,128], index: 2, kind: input, shape index: {}]   ;;  %s1091_s3 = inlined_call_operand.vmem [shape: f32[1,128], index: 3, kind: input, shape index: {}]   ;;  %s1092_s4 = inlined_call_operand.hbm [shape: f32[128,128], index: 4, kind: input, shape index: {}]   ;;  %s1093_s5 = inlined_call_operand.vmem [shape: f32[1,128], index: 5, kind: input, shape index: {}]   ;;  %s1094_s6 = inlined_call_operand.hbm [shape: f32[256,128], index: 6, kind: input, shape index: {}]   ;;  %s1095_s7 = inlined_call_operand.vmem [shape: f32[1,128], index: 7, kind: input, shape index: {}]   ;;  %s1096_s8 = inlined_call_operand.hbm [shape: f32[128,128], index: 8, kind: input, shape index: {}]   ;;  %s1097_s9 = inlined_call_operand.vmem [shape: f32[1,128], index: 9, kind: input, shape index: {}]   ;;  %s1098_s10 = inlined_call_operand.hbm [shape: f32[16,128], index: 10, kind: output, shape index: {}]  }
   0x1   :  { %16 = vsyncpa [#allocation6], 0 }
   0x2   :  { %17 = vsyncpa [#allocation9], 0 }
   0x3   :  { %18 = vsyncpa [#allocation12], 0 }
   0x4   :  { %19 = vsyncpa [#allocation4], 0  ;;  %s954_s13 = smov [#allocation5]   ;;  %s955_s15 = smov [#allocation8]  }
   0x5   :  { %s37_s14 = sshll.u32 %s954_s13, 4  ;;  %s63_s16 = sshll.u32 %s955_s15, 4  ;;  %s38_s14 = int_to_ptr.vmem [resolvable:$true] %s37_s14  ;;  %s64_s16 = int_to_ptr.vmem [resolvable:$true] %s63_s16 }
   0x6   :  { %s812_s17 = scalar_lea.vmem %s38_s14, 256  ;;  %p817_p1 = scmp.lt.s32.totalorder %s38_s14, %s38_s14 }
   0x7   :  { %p813_p0 = scmp.ne.s32.totalorder %s38_s14, %s812_s17  ;;  %p818_p2 = scmp.lt.s32.totalorder %s812_s17, %s812_s17 }
   0x9   :  { %p819_p3 = por %p818_p2, %p817_p1 }
   0xb   :  { %p820_p4 = pnand %p819_p3, %p813_p0 }
   0xd   :  { %823 = shalt.err (!%p820_p4)
}
   0xe   :  { %s956_s18 = smov 128   ;;  %s957_s19 = smov 8  }
   0xf   :  { %43 = dma.hbm_to_vmem [thread:$0]  %s1089_s1, 256, %s38_s14, [#allocation6], %s956_s18, %s956_s18, %s957_s19  }
  0x10   :  { %s832_s22 = scalar_lea.vmem %s64_s16, 2048  ;;  %p837_p6 = scmp.lt.s32.totalorder %s64_s16, %s64_s16 }
  0x11   :  { %p833_p5 = scmp.ne.s32.totalorder %s64_s16, %s832_s22  ;;  %p838_p7 = scmp.lt.s32.totalorder %s832_s22, %s832_s22 }
  0x13   :  { %p839_p8 = por %p838_p7, %p837_p6 }
  0x15   :  { %p840_p9 = pnand %p839_p8, %p833_p5 }
  0x17   :  { %843 = shalt.err (!%p840_p9)
}
  0x18   :  { %69 = dma.hbm_to_vmem [thread:$0]  %s1092_s4, 2048, %s64_s16, [#allocation9], %s956_s18, %s956_s18, %s957_s19  }
  0x19   :  { %s958_s25 = smov [#allocation2]   ;;  %s959_s27 = smov [#allocation7]  }
  0x1a   :  { %s25_s26 = sshll.u32 %s958_s25, 4  ;;  %s49_s28 = sshll.u32 %s959_s27, 4  ;;  %s26_s26 = int_to_ptr.vmem [resolvable:$true] %s25_s26  ;;  %s50_s28 = int_to_ptr.vmem [resolvable:$true] %s49_s28 }
  0x1b   :  { %s852_s1 = scalar_lea.vmem %s26_s26, 256  ;;  %p857_p11 = scmp.lt.s32.totalorder %s26_s26, %s26_s26 }
  0x1c   :  { %p853_p10 = scmp.ne.s32.totalorder %s26_s26, %s852_s1  ;;  %p858_p12 = scmp.lt.s32.totalorder %s852_s1, %s852_s1 }
  0x1e   :  { %p859_p13 = por %p858_p12, %p857_p11 }
  0x20   :  { %p860_p0 = pnand %p859_p13, %p853_p10 }
  0x22   :  { %863 = shalt.err (!%p860_p0)
}
  0x23   :  { %31 = dma.hbm_to_vmem [thread:$0]  %s1088_s0, 256, %s26_s26, [#allocation3], %s956_s18, %s956_s18, %s957_s19  }
  0x24   :  { %s872_s4 = scalar_lea.vmem %s50_s28, 2048  ;;  %p877_p2 = scmp.lt.s32.totalorder %s50_s28, %s50_s28 }
  0x25   :  { %p873_p1 = scmp.ne.s32.totalorder %s50_s28, %s872_s4  ;;  %p878_p3 = scmp.lt.s32.totalorder %s872_s4, %s872_s4 }
  0x27   :  { %p879_p4 = por %p878_p3, %p877_p2 }
  0x29   :  { %p880_p5 = pnand %p879_p4, %p873_p1 }
  0x2b   :  { %883 = shalt.err (!%p880_p5)
}
  0x2c   :  { %55 = dma.hbm_to_vmem [thread:$0]  %s1090_s2, 2048, %s50_s28, [#allocation6], %s956_s18, %s956_s18, %s957_s19  }
  0x2d   :  { %s960_s13 = smov [#allocation10]   ;;  %s961_s15 = smov [#allocation11]  }
  0x2e   :  { %s77_s14 = sshll.u32 %s960_s13, 4  ;;  %s91_s16 = sshll.u32 %s961_s15, 4  ;;  %s78_s14 = int_to_ptr.vmem [resolvable:$true] %s77_s14  ;;  %s92_s16 = int_to_ptr.vmem [resolvable:$true] %s91_s16 }
  0x2f   :  { %s892_s0 = scalar_lea.vmem %s78_s14, 4096  ;;  %p897_p7 = scmp.lt.s32.totalorder %s78_s14, %s78_s14 }
  0x30   :  { %p893_p6 = scmp.ne.s32.totalorder %s78_s14, %s892_s0  ;;  %p898_p8 = scmp.lt.s32.totalorder %s892_s0, %s892_s0 }
  0x32   :  { %p899_p9 = por %p898_p8, %p897_p7 }
  0x34   :  { %p900_p10 = pnand %p899_p9, %p893_p6 }
  0x36   :  { %903 = shalt.err (!%p900_p10)
}
  0x37   :  { %83 = dma.hbm_to_vmem [thread:$0]  %s1094_s6, 4096, %s78_s14, [#allocation9], %s956_s18, %s956_s18, %s957_s19  }
  0x38   :  { %s912_s2 = scalar_lea.vmem %s92_s16, 2048  ;;  %p917_p12 = scmp.lt.s32.totalorder %s92_s16, %s92_s16 }
  0x39   :  { %p913_p11 = scmp.ne.s32.totalorder %s92_s16, %s912_s2  ;;  %p918_p13 = scmp.lt.s32.totalorder %s912_s2, %s912_s2 }
  0x3b   :  { %p919_p0 = por %p918_p13, %p917_p12 }
  0x3d   :  { %p920_p1 = pnand %p919_p0, %p913_p11 }
  0x3f   :  { %923 = shalt.err (!%p920_p1)
}
  0x40   :  { %97 = dma.hbm_to_vmem [thread:$0]  %s1096_s8, 2048, %s92_s16, [#allocation12], %s956_s18, %s956_s18, %s957_s19  }
  0x41   :  { %944 = dma.done.wait [#allocation3], 256  }
  0x42   :  { %945 = vsyncadd [#allocation3], 4294967040 }
  0x43   :  { %946 = dma.done.wait [#allocation6], 2304  }
  0x44   :  { %947 = vsyncadd [#allocation6], 4294964992 }
  0x45   :  { %948 = dma.done.wait [#allocation9], 6144  }
  0x46   :  { %949 = vsyncadd [#allocation9], 4294961152 }
  0x47   :  { %950 = dma.done.wait [#allocation12], 2048  }
  0x48   :  { %951 = vsyncadd [#allocation12], 4294965248  ;;  %v135_v0 = vld [vmem:[#allocation7 + $0x78] sm:$0xff]  ;;  %v134_v2 = vld [vmem:[#allocation7 + $0x70] sm:$0xff]  ;;  %s962_s26 = smov [#allocation13]  }
  0x49   :  { %v237_v1 = vld [vmem:[#allocation8 + $0x78] sm:$0xff]  ;;  %674 = vmatprep.subr.mxu0 %v135_v0  ;;  %v236_v3 = vld [vmem:[#allocation8 + $0x70] sm:$0xff]  ;;  %v133_v4 = vld [vmem:[#allocation7 + $0x68] sm:$0xff]  ;;  %s561_s27 = sshll.u32 %s962_s26, 4  ;;  %s562_s27 = int_to_ptr.vmem [resolvable:$true] %s561_s27 }
  0x4a   :  { %709 = vmatprep.subr.mxu1 %v237_v1  ;;  %675 = vmatpush3.msra.mxu0 %v135_v0  ;;  %v235_v5 = vld [vmem:[#allocation8 + $0x68] sm:$0xff]  ;;  %v132_v6 = vld [vmem:[#allocation7 + $0x60] sm:$0xff]  ;;  %v131_v8 = vld [vmem:[#allocation7 + $0x58] sm:$0xff]  ;;  %s924_s28 = scalar_lea.vmem %s562_s27, 256  ;;  %p929_p3 = scmp.lt.s32.totalorder %s562_s27, %s562_s27 }
  0x4b   :  { %710 = vmatpush3.msra.mxu1 %v237_v1  ;;  %676 = vmatprep.subr.mxu0 %v134_v2  ;;  %v234_v7 = vld [vmem:[#allocation8 + $0x60] sm:$0xff]  ;;  %v233_v9 = vld [vmem:[#allocation8 + $0x58] sm:$0xff]  ;;  %v130_v10 = vld [vmem:[#allocation7 + $0x50] sm:$0xff]  ;;  %p925_p2 = scmp.ne.s32.totalorder %s562_s27, %s924_s28  ;;  %p930_p4 = scmp.lt.s32.totalorder %s924_s28, %s924_s28 }
  0x4c   :  { %711 = vmatprep.subr.mxu1 %v236_v3  ;;  %677 = vmatpush3.msra.mxu0 %v134_v2  ;;  %v232_v11 = vld [vmem:[#allocation8 + $0x50] sm:$0xff]  ;;  %v129_v12 = vld [vmem:[#allocation7 + $0x48] sm:$0xff]  ;;  %v128_v14 = vld [vmem:[#allocation7 + $0x40] sm:$0xff] }
  0x4d   :  { %712 = vmatpush3.msra.mxu1 %v236_v3  ;;  %678 = vmatprep.subr.mxu0 %v133_v4  ;;  %v231_v13 = vld [vmem:[#allocation8 + $0x48] sm:$0xff]  ;;  %v230_v15 = vld [vmem:[#allocation8 + $0x40] sm:$0xff]  ;;  %v127_v16 = vld [vmem:[#allocation7 + $0x38] sm:$0xff]  ;;  %p931_p5 = por %p930_p4, %p929_p3 }
  0x4e   :  { %713 = vmatprep.subr.mxu1 %v235_v5  ;;  %679 = vmatpush3.msra.mxu0 %v133_v4  ;;  %v229_v17 = vld [vmem:[#allocation8 + $0x38] sm:$0xff]  ;;  %v126_v18 = vld [vmem:[#allocation7 + $0x30] sm:$0xff]  ;;  %v125_v20 = vld [vmem:[#allocation7 + $0x28] sm:$0xff] }
  0x4f   :  { %714 = vmatpush3.msra.mxu1 %v235_v5  ;;  %680 = vmatprep.subr.mxu0 %v132_v6  ;;  %v228_v19 = vld [vmem:[#allocation8 + $0x30] sm:$0xff]  ;;  %v227_v21 = vld [vmem:[#allocation8 + $0x28] sm:$0xff]  ;;  %v124_v22 = vld [vmem:[#allocation7 + $0x20] sm:$0xff]  ;;  %p932_p6 = pnand %p931_p5, %p925_p2 }
  0x50   :  { %715 = vmatprep.subr.mxu1 %v234_v7  ;;  %681 = vmatpush3.msra.mxu0 %v132_v6  ;;  %v226_v23 = vld [vmem:[#allocation8 + $0x20] sm:$0xff]  ;;  %v123_v24 = vld [vmem:[#allocation7 + $0x18] sm:$0xff]  ;;  %v122_v26 = vld [vmem:[#allocation7 + $0x10] sm:$0xff] }
  0x51   :  { %716 = vmatpush3.msra.mxu1 %v234_v7  ;;  %682 = vmatprep.subr.mxu0 %v131_v8  ;;  %v225_v25 = vld [vmem:[#allocation8 + $0x18] sm:$0xff]  ;;  %v224_v27 = vld [vmem:[#allocation8 + $0x10] sm:$0xff]  ;;  %v121_v28 = vld [vmem:[#allocation7 + $0x8] sm:$0xff] }
  0x52   :  { %717 = vmatprep.subr.mxu1 %v233_v9  ;;  %683 = vmatpush3.msra.mxu0 %v131_v8  ;;  %v223_v29 = vld [vmem:[#allocation8 + $0x8] sm:$0xff]  ;;  %v120_v30 = vld [vmem:[#allocation7] sm:$0xff]  ;;  %v220_v33 = vld [vmem:[#allocation5] sm:$0xff] }
  0x53   :  { %718 = vmatpush3.msra.mxu1 %v233_v9  ;;  %684 = vmatprep.subr.mxu0 %v130_v10  ;;  %v222_v31 = vld [vmem:[#allocation8] sm:$0xff]  ;;  %v119_v34 = vld [vmem:[#allocation2 + $0x8] sm:$0xff]  ;;  %v221_v35 = vld [vmem:[#allocation5 + $0x8] sm:$0xff] }
  0x54   :  { %719 = vmatprep.subr.mxu1 %v232_v11  ;;  %685 = vmatpush3.msra.mxu0 %v130_v10  ;;  %v118_v32 = vld [vmem:[#allocation2] sm:$0xff]  ;;  %v353_v36 = vld [vmem:[#allocation10 + $0xf8] sm:$0xff]  ;;  %v352_v38 = vld [vmem:[#allocation10 + $0xf0] sm:$0xff] }
  0x55   :  { %720 = vmatpush3.msra.mxu1 %v232_v11  ;;  %686 = vmatprep.subr.mxu0 %v129_v12  ;;  %v337_v37 = vld [vmem:[#allocation10 + $0x78] sm:$0xff]  ;;  %v336_v39 = vld [vmem:[#allocation10 + $0x70] sm:$0xff]  ;;  %v351_v40 = vld [vmem:[#allocation10 + $0xe8] sm:$0xff] }
  0x56   :  { %721 = vmatprep.subr.mxu1 %v231_v13  ;;  %687 = vmatpush3.msra.mxu0 %v129_v12  ;;  %v335_v41 = vld [vmem:[#allocation10 + $0x68] sm:$0xff]  ;;  %v350_v42 = vld [vmem:[#allocation10 + $0xe0] sm:$0xff]  ;;  %v349_v44 = vld [vmem:[#allocation10 + $0xd8] sm:$0xff] }
  0x57   :  { %722 = vmatpush3.msra.mxu1 %v231_v13  ;;  %688 = vmatprep.subr.mxu0 %v128_v14  ;;  %v334_v43 = vld [vmem:[#allocation10 + $0x60] sm:$0xff]  ;;  %v333_v45 = vld [vmem:[#allocation10 + $0x58] sm:$0xff]  ;;  %v348_v46 = vld [vmem:[#allocation10 + $0xd0] sm:$0xff] }
  0x58   :  { %723 = vmatprep.subr.mxu1 %v230_v15  ;;  %689 = vmatpush3.msra.mxu0 %v128_v14  ;;  %v332_v47 = vld [vmem:[#allocation10 + $0x50] sm:$0xff]  ;;  %v347_v48 = vld [vmem:[#allocation10 + $0xc8] sm:$0xff]  ;;  %v346_v50 = vld [vmem:[#allocation10 + $0xc0] sm:$0xff] }
  0x59   :  { %724 = vmatpush3.msra.mxu1 %v230_v15  ;;  %690 = vmatprep.subr.mxu0 %v127_v16  ;;  %v331_v49 = vld [vmem:[#allocation10 + $0x48] sm:$0xff]  ;;  %v330_v51 = vld [vmem:[#allocation10 + $0x40] sm:$0xff]  ;;  %v345_v52 = vld [vmem:[#allocation10 + $0xb8] sm:$0xff] }
  0x5a   :  { %725 = vmatprep.subr.mxu1 %v229_v17  ;;  %691 = vmatpush3.msra.mxu0 %v127_v16  ;;  %v329_v53 = vld [vmem:[#allocation10 + $0x38] sm:$0xff]  ;;  %v344_v54 = vld [vmem:[#allocation10 + $0xb0] sm:$0xff]  ;;  %v343_v56 = vld [vmem:[#allocation10 + $0xa8] sm:$0xff] }
  0x5b   :  { %726 = vmatpush3.msra.mxu1 %v229_v17  ;;  %692 = vmatprep.subr.mxu0 %v126_v18  ;;  %v328_v55 = vld [vmem:[#allocation10 + $0x30] sm:$0xff]  ;;  %v327_v57 = vld [vmem:[#allocation10 + $0x28] sm:$0xff]  ;;  %v342_v58 = vld [vmem:[#allocation10 + $0xa0] sm:$0xff] }
  0x5c   :  { %727 = vmatprep.subr.mxu1 %v228_v19  ;;  %693 = vmatpush3.msra.mxu0 %v126_v18  ;;  %v326_v59 = vld [vmem:[#allocation10 + $0x20] sm:$0xff]  ;;  %v341_v60 = vld [vmem:[#allocation10 + $0x98] sm:$0xff]  ;;  %v340_v62 = vld [vmem:[#allocation10 + $0x90] sm:$0xff] }
  0x5d   :  { %728 = vmatpush3.msra.mxu1 %v228_v19  ;;  %694 = vmatprep.subr.mxu0 %v125_v20  ;;  %v325_v61 = vld [vmem:[#allocation10 + $0x18] sm:$0xff]  ;;  %v324_v63 = vld [vmem:[#allocation10 + $0x10] sm:$0xff]  ;;  %v339_v0 = vld [vmem:[#allocation10 + $0x88] sm:$0xff] }
  0x5e   :  { %729 = vmatprep.subr.mxu1 %v227_v21  ;;  %695 = vmatpush3.msra.mxu0 %v125_v20  ;;  %v323_v1 = vld [vmem:[#allocation10 + $0x8] sm:$0xff]  ;;  %v338_v2 = vld [vmem:[#allocation10 + $0x80] sm:$0xff]  ;;  %v471_v18 = vld [vmem:[#allocation11 + $0x78] sm:$0xff] }
  0x5f   :  { %730 = vmatpush3.msra.mxu1 %v227_v21  ;;  %696 = vmatprep.subr.mxu0 %v124_v22  ;;  %v322_v3 = vld [vmem:[#allocation10] sm:$0xff]  ;;  %v470_v19 = vld [vmem:[#allocation11 + $0x70] sm:$0xff]  ;;  %v469_v20 = vld [vmem:[#allocation11 + $0x68] sm:$0xff] }
  0x60   :  { %731 = vmatprep.subr.mxu1 %v226_v23  ;;  %697 = vmatpush3.msra.mxu0 %v124_v22  ;;  %v576_v5 = vld [vmem:[%s1091_s3] ss:$0 sm:$0xff]  ;;  %v467_v22 = vld [vmem:[#allocation11 + $0x58] sm:$0xff] }
  0x61   :  { %732 = vmatpush3.msra.mxu1 %v226_v23  ;;  %698 = vmatprep.subr.mxu0 %v123_v24  ;;  %v577_v7 = vld [vmem:[%s1093_s5] ss:$0 sm:$0xff]  ;;  %v466_v23 = vld [vmem:[#allocation11 + $0x50] sm:$0xff] }
  0x62   :  { %733 = vmatprep.subr.mxu1 %v225_v25  ;;  %699 = vmatpush3.msra.mxu0 %v123_v24  ;;  %v468_v21 = vld [vmem:[#allocation11 + $0x60] sm:$0xff]  ;;  %v465_v24 = vld [vmem:[#allocation11 + $0x48] sm:$0xff] }
  0x63   :  { %734 = vmatpush3.msra.mxu1 %v225_v25  ;;  %700 = vmatprep.subr.mxu0 %v122_v26  ;;  %v464_v25 = vld [vmem:[#allocation11 + $0x40] sm:$0xff] }
  0x64   :  { %735 = vmatprep.subr.mxu1 %v224_v27  ;;  %701 = vmatpush3.msra.mxu0 %v122_v26  ;;  %v463_v26 = vld [vmem:[#allocation11 + $0x38] sm:$0xff] }
  0x65   :  { %736 = vmatpush3.msra.mxu1 %v224_v27  ;;  %702 = vmatprep.subr.mxu0 %v121_v28  ;;  %v462_v27 = vld [vmem:[#allocation11 + $0x30] sm:$0xff] }
  0x66   :  { %737 = vmatprep.subr.mxu1 %v223_v29  ;;  %703 = vmatpush3.msra.mxu0 %v121_v28  ;;  %v461_v28 = vld [vmem:[#allocation11 + $0x28] sm:$0xff] }
  0x67   :  { %738 = vmatpush3.msra.mxu1 %v223_v29  ;;  %704 = vmatprep.subr.mxu0 %v120_v30  ;;  %v460_v29 = vld [vmem:[#allocation11 + $0x20] sm:$0xff] }
  0x68   :  { %739 = vmatprep.subr.mxu1 %v222_v31  ;;  %705 = vmatpush3.msra.mxu0 %v120_v30  ;;  %v459_v30 = vld [vmem:[#allocation11 + $0x18] sm:$0xff] }
  0x69   :  { %706 = vmatprep.mubr.f32.mxu0 %v118_v32  ;;  %740 = vmatpush3.msra.mxu1 %v222_v31  ;;  %v458_v31 = vld [vmem:[#allocation11 + $0x10] sm:$0xff]  ;;  %v457_v32 = vld [vmem:[#allocation11 + $0x8] sm:$0xff] }
  0x6a   :  { %741 = vmatprep.mubr.f32.mxu1 %v220_v33  ;;  %707 = vmatmul.mubr.f32.vlgmr.msra.gmra.mxu0 %v119_v34  ;;  %v456_v33 = vld [vmem:[#allocation11] sm:$0xff] }
  0x6b   :  { %742 = vmatmul.mubr.f32.vlgmr.msra.gmra.mxu1 %v221_v35  ;;  %618 = vmatprep.subr.mxu0 %v353_v36  ;;  %v578_v35 = vld [vmem:[%s1095_s7] ss:$0 sm:$0xff] }
  0x6c   :  { %619 = vmatpush3.msra.mxu0 %v337_v37  ;;  %744 = vmatprep.subr.mxu1 %v471_v18 }
  0x6d   :  { %620 = vmatprep.subr.mxu0 %v352_v38  ;;  %745 = vmatpush3.msra.mxu1 %v471_v18 }
  0x6e   :  { %621 = vmatpush3.msra.mxu0 %v336_v39  ;;  %746 = vmatprep.subr.mxu1 %v470_v19 }
  0x6f   :  { %622 = vmatprep.subr.mxu0 %v351_v40  ;;  %747 = vmatpush3.msra.mxu1 %v470_v19 }
  0x70   :  { %623 = vmatpush3.msra.mxu0 %v335_v41  ;;  %748 = vmatprep.subr.mxu1 %v469_v20 }
  0x71   :  { %624 = vmatprep.subr.mxu0 %v350_v42  ;;  %749 = vmatpush3.msra.mxu1 %v469_v20 }
  0x72   :  { %625 = vmatpush3.msra.mxu0 %v334_v43  ;;  %750 = vmatprep.subr.mxu1 %v468_v21 }
  0x73   :  { %626 = vmatprep.subr.mxu0 %v349_v44  ;;  %751 = vmatpush3.msra.mxu1 %v468_v21 }
  0x74   :  { %627 = vmatpush3.msra.mxu0 %v333_v45  ;;  %752 = vmatprep.subr.mxu1 %v467_v22 }
  0x75   :  { %628 = vmatprep.subr.mxu0 %v348_v46  ;;  %753 = vmatpush3.msra.mxu1 %v467_v22 }
  0x76   :  { %629 = vmatpush3.msra.mxu0 %v332_v47  ;;  %754 = vmatprep.subr.mxu1 %v466_v23 }
  0x77   :  { %630 = vmatprep.subr.mxu0 %v347_v48  ;;  %755 = vmatpush3.msra.mxu1 %v466_v23 }
  0x78   :  { %631 = vmatpush3.msra.mxu0 %v331_v49  ;;  %756 = vmatprep.subr.mxu1 %v465_v24 }
  0x79   :  { %632 = vmatprep.subr.mxu0 %v346_v50  ;;  %757 = vmatpush3.msra.mxu1 %v465_v24 }
  0x7a   :  { %633 = vmatpush3.msra.mxu0 %v330_v51  ;;  %758 = vmatprep.subr.mxu1 %v464_v25 }
  0x7b   :  { %634 = vmatprep.subr.mxu0 %v345_v52  ;;  %759 = vmatpush3.msra.mxu1 %v464_v25 }
  0x7c   :  { %635 = vmatpush3.msra.mxu0 %v329_v53  ;;  %760 = vmatprep.subr.mxu1 %v463_v26 }
  0x7d   :  { %636 = vmatprep.subr.mxu0 %v344_v54  ;;  %761 = vmatpush3.msra.mxu1 %v463_v26 }
  0x7e   :  { %637 = vmatpush3.msra.mxu0 %v328_v55  ;;  %762 = vmatprep.subr.mxu1 %v462_v27 }
  0x7f   :  { %638 = vmatprep.subr.mxu0 %v343_v56  ;;  %763 = vmatpush3.msra.mxu1 %v462_v27 }
  0x80   :  { %639 = vmatpush3.msra.mxu0 %v327_v57  ;;  %764 = vmatprep.subr.mxu1 %v461_v28 }
  0x81   :  { %640 = vmatprep.subr.mxu0 %v342_v58  ;;  %765 = vmatpush3.msra.mxu1 %v461_v28 }
  0x82   :  { %641 = vmatpush3.msra.mxu0 %v326_v59  ;;  %766 = vmatprep.subr.mxu1 %v460_v29  ;;  %v581_v59 = vld [vmem:[%s1097_s9] ss:$0 sm:$0xff] }
  0x83   :  { %642 = vmatprep.subr.mxu0 %v341_v60  ;;  %767 = vmatpush3.msra.mxu1 %v460_v29 }
  0x84   :  { %643 = vmatpush3.msra.mxu0 %v325_v61  ;;  %768 = vmatprep.subr.mxu1 %v459_v30 }
  0x85   :  { %644 = vmatprep.subr.mxu0 %v340_v62  ;;  %769 = vmatpush3.msra.mxu1 %v459_v30 }
  0x86   :  { %645 = vmatpush3.msra.mxu0 %v324_v63  ;;  %770 = vmatprep.subr.mxu1 %v458_v31 }
  0x87   :  { %646 = vmatprep.subr.mxu0 %v339_v0  ;;  %771 = vmatpush3.msra.mxu1 %v458_v31 }
  0x88   :  { %647 = vmatpush3.msra.mxu0 %v323_v1  ;;  %772 = vmatprep.subr.mxu1 %v457_v32 }
  0x89   :  { %648 = vmatprep.subr.mxu0 %v338_v2  ;;  %773 = vmatpush3.msra.mxu1 %v457_v32 }
  0x8a   :  { %649 = vmatpush3.msra.mxu0 %v322_v3  ;;  %774 = vmatprep.subr.mxu1 %v456_v33 }
  0x8b   :  { %775 = vmatpush3.msra.mxu1 %v456_v33 }
 0x12a   :  { %v708_v4 = vpop.f32.mrf.mxu0 }
 0x12b   :  { %v743_v6 = vpop.f32.mrf.mxu1  ;;  %v215_v13 = vadd.f32 %v708_v4, %v576_v5 }
 0x12c   :  { %v209_v8 = vpop.f32.mrf.mxu0  ;;  %v317_v12 = vadd.f32 %v743_v6, %v577_v7 }
 0x12d   :  { %v311_v9 = vpop.f32.mrf.mxu1  ;;  %v210_v10 = vadd.f32 %v576_v5, %v209_v8 }
 0x12e   :  { %v312_v11 = vadd.f32 %v577_v7, %v311_v9 }
 0x12f   :  { %788 = vtanh.f32 %v210_v10 }
 0x130   :  { %790 = vtanh.f32 %v312_v11 }
 0x131   :  { %792 = vtanh.f32 %v317_v12 }
 0x132   :  { %794 = vtanh.f32 %v215_v13 }
 0x13c   :  { %v1060_v14 = vpop.eup %788 }
 0x13d   :  { %v1062_v15 = vpop.eup %790 }
 0x13e   :  { %425 = vmatprep.mubr.f32.mxu0 %v1062_v15  ;;  %v1065_v16 = vpop.eup %792 }
 0x13f   :  { %426 = vmatmul.mubr.f32.vlgmr.msra.gmra.mxu0 %v1060_v14  ;;  %v1069_v17 = vpop.eup %794 }
 0x140   :  { %430 = vmatprep.mubr.f32.mxu0 %v1065_v16 }
 0x143   :  { %431 = vmatmul.mubr.f32.gmra.mxu0 %v1069_v17 }
 0x1ff   :  { %v650_v34 = vpop.f32.mrf.mxu0 }
 0x201   :  { %v651_v36 = vpop.f32.mrf.mxu0 }
 0x202   :  { %v652_v37 = vadd.f32 %v651_v36, %v650_v34 }
 0x203   :  { %v653_v38 = vpop.f32.mrf.mxu0 }
 0x204   :  { %v428_v39 = vadd.f32 %v652_v37, %v578_v35 }
 0x205   :  { %v654_v40 = vpop.f32.mrf.mxu0 }
 0x206   :  { %v579_v41 = vmul.f32 -1.442695, %v428_v39  ;;  %v655_v42 = vadd.f32 %v654_v40, %v653_v38 }
 0x208   :  { %796 = vpow2.f32 %v579_v41  ;;  %v433_v43 = vadd.f32 %v655_v42, %v578_v35 }
 0x20a   :  { %v580_v44 = vmul.f32 -1.442695, %v433_v43 }
 0x20c   :  { %798 = vpow2.f32 %v580_v44 }
 0x215   :  { %v797_v45 = vpop.eup %796 }
 0x216   :  { %v442_v46 = vadd.f32 1.0, %v797_v45 }
 0x218   :  { %800 = vrcp.f32 %v442_v46 }
 0x219   :  { %v799_v47 = vpop.eup %798 }
 0x21a   :  { %v443_v48 = vadd.f32 1.0, %v799_v47 }
 0x21c   :  { %802 = vrcp.f32 %v443_v48 }
 0x225   :  { %v801_v49 = vpop.eup %800 }
 0x226   :  { %v450_v50 = vsub.f32 1.0, %v801_v49  ;;  %v448_v51 = vmul.f32 %v801_v49, %v1060_v14 }
 0x228   :  { %v452_v52 = vmul.f32 %v1062_v15, %v450_v50 }
 0x229   :  { %v803_v53 = vpop.eup %802 }
 0x22a   :  { %v454_v54 = vadd.f32 %v452_v52, %v448_v51  ;;  %v451_v55 = vsub.f32 1.0, %v803_v53  ;;  %v449_v56 = vmul.f32 %v803_v53, %v1069_v17 }
 0x22c   :  { %776 = vmatprep.mubr.f32.mxu1 %v454_v54  ;;  %v453_v57 = vmul.f32 %v1065_v16, %v451_v55 }
 0x22e   :  { %v455_v58 = vadd.f32 %v453_v57, %v449_v56 }
 0x230   :  { %777 = vmatmul.mubr.f32.vlgmr.msra.gmra.mxu1 %v455_v58 }
 0x2f0   :  { %v778_v60 = vpop.f32.mrf.mxu1 }
 0x2f1   :  { %v551_v61 = vadd.f32 %v778_v60, %v581_v59 }
 0x2f2   :  { %v545_v62 = vpop.f32.mrf.mxu1 }
 0x2f3   :  { %555 = vst [vmem:[#allocation13 + $0x8] sm:$0xff] %v551_v61  ;;  %v546_v63 = vadd.f32 %v581_v59, %v545_v62 }
 0x2f5   :  { %554 = vst [vmem:[#allocation13] sm:$0xff] %v546_v63 }
 0x2f6   :  { %935 = shalt.err (!%p932_p6)
}
 0x2f7   :  { %567 = dma.vmem_to_hbm [thread:$0]  %s562_s27, 256, %s1098_s10, [#allocation4], %s956_s18, %s956_s18, %s957_s19  }
 0x2f8   :  { %952 = dma.done.wait [#allocation4], 256  }
 0x2f9   :  { %953 = vsyncadd [#allocation4], 4294967040 }
 0x2fa   :  { %571 = vsyncpa [#allocation3], 1 }
 0x2fb   :  { %572 = vsyncpa [#allocation6], 1 }
 0x2fc   :  { %573 = vsyncpa [#allocation9], 1 }
 0x2fd   :  { %574 = vsyncpa [#allocation12], 1 }
 0x2fe   :  { %575 = vsyncpa [#allocation4], 1 }

</bundles_post_ra>
